<compile_context>
chip_gen: v7x
topology: tpu7x:2x2x1
jax: 0.10.0
libtpu: 0.0.40
codegen_flags: <defaults>
</compile_context>

<pallas_src>
import jax
import jax.numpy as jnp
from jax.experimental import pallas as pl
from jax.experimental.pallas import tpu as pltpu


_NEG = -1e30  # additive pool-mask value (valid pre-pool values are finite)


# ---------------------------------------------------------------------------
# The fused kernel (one batch block per grid step).
# ---------------------------------------------------------------------------
def fused_cnn_lstm_kernel(ids_ref, wconv_ref, convb_ref, mask_ref,
                          wg_ref, bg_ref, fcw_ref, fcb_ref, out_ref):
    # ids_ref   : (BB*L_r, max_fs) int32  im2col'd token ids (tap k in column k)
    # wconv_ref : (max_fs, V, 3F)  bf16   embedding folded into conv-tap weights
    # convb_ref : (1, 3F)          f32    conv biases (applied after the pool)
    # mask_ref  : (L_r, 3F)        f32    additive pool mask (0 valid / -1e30)
    # wg_ref    : (3F, 6H)         bf16   LSTM W_ih cols [i_f i_r o_f o_r g_f g_r]
    # bg_ref    : (1, 6H)          f32    b_ih + b_hh, same column order
    # fcw_ref   : (2H, Cp)         bf16   final linear weight, lane-padded Cp=128
    # fcb_ref   : (1, Cp)          f32
    # out_ref   : (1, BB, Cp)      f32
    M, max_fs = ids_ref.shape
    _, V, F3 = wconv_ref.shape
    BB = out_ref.shape[1]
    L_r = M // BB

    # ---- Conv1d with the embedding pre-folded into the tap weights ---------
    # One bf16 one-hot (M, V) matmul per tap; ids were im2col'd host-side so
    # no activation slice starts at a non-8-aligned row offset.
    # TODO(synk): large-vocab path = scalar-prefetched ids + DMA row gather.
    vocab_iota = jax.lax.broadcasted_iota(jnp.int32, (M, V), 1)
    acc = jnp.zeros((M, F3), jnp.float32)
    for k in range(max_fs):                                   # static, tiny
        onehot = (vocab_iota == ids_ref[:, k:k + 1]).astype(jnp.bfloat16)
        acc = acc + jnp.dot(onehot, wconv_ref[k],
                            preferred_element_type=jnp.float32)

    # ---- vectorized masked max-pool over time -------------------------------
    # Over-hanging taps and sublane-padding rows carry -1e30 from the host
    # mask; bias + ReLU moved after the pool (mathematically identical).
    acc3 = acc.reshape(BB, L_r, F3) + mask_ref[...][None, :, :]
    pooled = jnp.max(acc3, axis=1)                            # (BB, 3F)
    cat = jnp.maximum(pooled + convb_ref[...], 0.0)
    # dropout == identity at inference time.

    # ---- bidirectional LSTM, seq_len == 1, h0 = c0 = 0 ----------------------
    # W_hh multiplies h0 == 0 and the forget gate multiplies c0 == 0, so both
    # drop exactly.  Fwd/rev gates fused column-wise: [i_f i_r | o_f o_r | g_f g_r].
    gates = jnp.dot(cat.astype(jnp.bfloat16), wg_ref[...],
                    preferred_element_type=jnp.float32) + bg_ref[...]
    H2 = wg_ref.shape[1] // 3                                 # == 2*hidden_dim
    so = jax.nn.sigmoid(gates[:, 0:2 * H2])                   # i|o, 128-lane slice
    g = jnp.tanh(gates[:, 2 * H2:3 * H2])                     # [g_f | g_r]
    h_cat = so[:, H2:2 * H2] * jnp.tanh(so[:, 0:H2] * g)      # (BB, 2H) = [h_f|h_r]

    # ---- final fully connected, lane-dense (Cp = 128) output store ----------
    out_ref[0] = (jnp.dot(h_cat.astype(jnp.bfloat16), fcw_ref[...],
                          preferred_element_type=jnp.float32) + fcb_ref[...])


# ---------------------------------------------------------------------------
# Parameters: torch-layout init + one-time kernel-layout preparation.
# ---------------------------------------------------------------------------
def init_params(key, vocab_size, embed_dim, hidden_dim, num_classes,
                n_filters, filter_sizes):
    keys = jax.random.split(key, 16)
    params = {}
    emb = 0.1 * jax.random.normal(keys[0], (vocab_size, embed_dim), jnp.float32)
    emb = emb.at[0].set(0.0)  # padding_idx = 0
    params["embedding"] = emb

    convs = []
    for i, fs in enumerate(filter_sizes):
        w = 0.05 * jax.random.normal(keys[1 + i], (n_filters, embed_dim, fs),
                                     jnp.float32)   # torch Conv1d weight (F,E,fs)
        b = 0.05 * jax.random.normal(keys[4 + i], (n_filters,), jnp.float32)
        convs.append((w, b))
    params["convs"] = convs

    D = n_filters * len(filter_sizes)
    H = hidden_dim
    # W_hh omitted: with seq_len == 1 and h0 == 0 its contribution is exactly 0.
    params["w_ih_f"] = 0.05 * jax.random.normal(keys[7], (4 * H, D), jnp.float32)
    params["b_ih_f"] = 0.05 * jax.random.normal(keys[8], (4 * H,), jnp.float32)
    params["b_hh_f"] = 0.05 * jax.random.normal(keys[9], (4 * H,), jnp.float32)
    params["w_ih_r"] = 0.05 * jax.random.normal(keys[10], (4 * H, D), jnp.float32)
    params["b_ih_r"] = 0.05 * jax.random.normal(keys[11], (4 * H,), jnp.float32)
    params["b_hh_r"] = 0.05 * jax.random.normal(keys[12], (4 * H,), jnp.float32)
    params["fc_w"] = 0.05 * jax.random.normal(keys[13], (num_classes, 2 * H),
                                              jnp.float32)
    params["fc_b"] = 0.05 * jax.random.normal(keys[14], (num_classes,),
                                              jnp.float32)
    return params


def prepare_params(params, filter_sizes, num_classes):
    """One-time re-layout of torch-style weights into the fused-kernel layout."""
    emb = params["embedding"]                          # (V, E) f32
    V, E = emb.shape
    F = params["convs"][0][0].shape[0]
    n_groups = len(filter_sizes)
    max_fs = int(max(filter_sizes))
    nF = F * n_groups

    # Fold the embedding into the conv weights (one (V, 3F) table per tap):
    #   W'_k[v, :] = emb[v] @ conv_w[:, :, k].T ; taps k >= fs stay zero.
    w_fold = jnp.zeros((max_fs, V, nF), jnp.float32)
    b_list, fs_list = [], []
    for g, ((w, b), fs) in enumerate(zip(params["convs"], filter_sizes)):
        for k in range(fs):
            w_fold = w_fold.at[k, :, g * F:(g + 1) * F].set(emb @ w[:, :, k].T)
        b_list.append(b)
        fs_list.append(jnp.full((F,), fs, jnp.int32))
    conv_b = jnp.concatenate(b_list).reshape(1, nF)
    col_fs = jnp.concatenate(fs_list)                  # (nF,) filter size / column

    # LSTM: drop the dead forget gate, fuse fwd/rev, order [i_f i_r o_f o_r g_f g_r].
    H = params["w_ih_f"].shape[0] // 4
    wf, wr = params["w_ih_f"], params["w_ih_r"]
    bf = params["b_ih_f"] + params["b_hh_f"]
    br = params["b_ih_r"] + params["b_hh_r"]
    w_gates = jnp.concatenate(
        [wf[0 * H:1 * H].T, wr[0 * H:1 * H].T,         # i
         wf[3 * H:4 * H].T, wr[3 * H:4 * H].T,         # o
         wf[2 * H:3 * H].T, wr[2 * H:3 * H].T],        # g
        axis=1)                                        # (3F, 6H)
    b_gates = jnp.concatenate(
        [bf[0 * H:1 * H], br[0 * H:1 * H],
         bf[3 * H:4 * H], br[3 * H:4 * H],
         bf[2 * H:3 * H], br[2 * H:3 * H]]).reshape(1, 6 * H)

    # FC weight: transpose and lane-pad the class dim to a 128 multiple.
    C_pad = max(128, ((num_classes + 127) // 128) * 128)
    fc_w = jnp.zeros((2 * H, C_pad), jnp.float32).at[:, :num_classes].set(
        params["fc_w"].T)
    fc_b = jnp.zeros((1, C_pad), jnp.float32).at[0, :num_classes].set(
        params["fc_b"])

    # Matmul operands stored in bf16 (f32 MXU accumulation in-kernel);
    # biases / masks / non-linearities stay f32 (v5e-safe).
    return dict(
        conv_w=w_fold.astype(jnp.bfloat16), conv_b=conv_b, col_fs=col_fs,
        w_gates=w_gates.astype(jnp.bfloat16), b_gates=b_gates,
        fc_w=fc_w.astype(jnp.bfloat16), fc_b=fc_b,
        max_fs=max_fs, num_classes=num_classes)


# ---------------------------------------------------------------------------
# Forward pass: one fused pallas_call.
# ---------------------------------------------------------------------------
def forward(prep, text_batch):
    B, L = text_batch.shape
    max_fs = int(prep["max_fs"])
    num_classes = int(prep["num_classes"])
    assert L >= max_fs, "sequence length must be >= the largest filter size"

    L_r = ((L + 7) // 8) * 8          # sublane-align the per-example row count

    # Host-side im2col of the token ids: ids2[b, t, k] = text[b, t+k].  Clipped
    # ids past the end never matter: those taps hit zero-padded weight columns
    # or the row is masked before the pool.  Tiny int32 tensor, O(B*L*max_fs).
    idx = jnp.arange(L_r)[:, None] + jnp.arange(max_fs)[None, :]   # (L_r, max_fs)
    gathered = text_batch.astype(jnp.int32)[:, jnp.minimum(idx, L - 1)]
    ids2 = jnp.where((idx < L)[None, :, :], gathered, 0)           # (B, L_r, max_fs)

    # Batch blocking: >= 2 blocks whenever B > 1 so the "parallel" grid axis can
    # shard across v7x's two TensorCores, while targeting a few hundred conv
    # rows per block (amortizes MXU fill/drain + ~0.35us grid-step overhead).
    target_rows = 512                  # re-derive per generation if VMEM-bound
    BB = max(1, min(B, target_rows // L_r))
    if B > 1:
        BB = max(1, min(BB, (B + 1) // 2))
    num_blocks = -(-B // BB)
    B_pad = num_blocks * BB
    if B_pad > B:
        ids2 = jnp.concatenate(
            [ids2, jnp.zeros((B_pad - B, L_r, max_fs), jnp.int32)], axis=0)
    ids_flat = ids2.reshape(B_pad * L_r, max_fs)

    # Additive pool mask, hoisted out of the kernel: row t of a filter-size-fs
    # column is valid iff t <= L - fs; padded rows t >= L are always invalid.
    t_iota = jnp.arange(L_r)[:, None]
    pool_mask = jnp.where(t_iota < (L + 1 - prep["col_fs"])[None, :],
                          0.0, _NEG).astype(jnp.float32)           # (L_r, 3F)

    V, F3 = prep["conv_w"].shape[1], prep["conv_w"].shape[2]
    G6 = prep["w_gates"].shape[1]
    H2, Cp = prep["fc_w"].shape

    out = pl.pallas_call(
        fused_cnn_lstm_kernel,
        out_shape=jax.ShapeDtypeStruct((num_blocks, BB, Cp), jnp.float32),
        grid=(num_blocks,),
        in_specs=[
            pl.BlockSpec((BB * L_r, max_fs), lambda i: (i, 0)),     # im2col ids
            pl.BlockSpec((max_fs, V, F3), lambda i: (0, 0, 0)),     # folded conv W
            pl.BlockSpec((1, F3), lambda i: (0, 0)),                # conv bias
            pl.BlockSpec((L_r, F3), lambda i: (0, 0)),              # pool mask
            pl.BlockSpec((F3, G6), lambda i: (0, 0)),               # LSTM W_ih
            pl.BlockSpec((1, G6), lambda i: (0, 0)),                # LSTM bias
            pl.BlockSpec((H2, Cp), lambda i: (0, 0)),               # FC weight
            pl.BlockSpec((1, Cp), lambda i: (0, 0)),                # FC bias
        ],
        out_specs=pl.BlockSpec((1, BB, Cp), lambda i: (i, 0, 0)),
        compiler_params=pltpu.CompilerParams(
            dimension_semantics=("parallel",),
            # Explicit VMEM budget (weights are tiny here).  For production-
            # sized embedding tables keep the folded table in HBM behind
            # memory_space=pl.ANY + one manual copy instead of a resident,
            # double-buffered BlockSpec.
            vmem_limit_bytes=32 * 1024 * 1024),
    )(ids_flat, prep["conv_w"], prep["conv_b"], pool_mask,
      prep["w_gates"], prep["b_gates"], prep["fc_w"], prep["fc_b"])

    return out.reshape(B_pad, Cp)[:B, :num_classes]


# ---------------------------------------------------------------------------
# Pure-JAX reference (mirrors the PyTorch module at inference).
# ---------------------------------------------------------------------------
def reference_forward(params, text_batch, filter_sizes):
    emb = params["embedding"][text_batch]                      # (B, L, E)
    pooled = []
    for (w, b), fs in zip(params["convs"], filter_sizes):
        L_out = emb.shape[1] - fs + 1
        out = b[None, None, :]
        for k in range(fs):
            out = out + jnp.einsum("ble,fe->blf", emb[:, k:k + L_out, :],
                                   w[:, :, k])
        pooled.append(jnp.max(jax.nn.relu(out), axis=1))       # (B, F)
    cat = jnp.concatenate(pooled, axis=1)                      # (B, 3F)

    def cell(w_ih, b_ih, b_hh):
        H = w_ih.shape[0] // 4
        gts = cat @ w_ih.T + b_ih + b_hh
        i = jax.nn.sigmoid(gts[:, 0:H])
        g = jnp.tanh(gts[:, 2 * H:3 * H])
        o = jax.nn.sigmoid(gts[:, 3 * H:4 * H])
        return o * jnp.tanh(i * g)                             # f-gate * c0==0 drops

    h = jnp.concatenate(
        [cell(params["w_ih_f"], params["b_ih_f"], params["b_hh_f"]),
         cell(params["w_ih_r"], params["b_ih_r"], params["b_hh_r"])], axis=1)
    return h @ params["fc_w"].T + params["fc_b"][None, :]


if __name__ == "__main__":
    vocab_size, embed_dim, hidden_dim, num_classes = 50, 32, 32, 4
    n_filters, filter_sizes = 16, (3, 4, 5)
    B, L = 2, 16

    key = jax.random.PRNGKey(0)
    pkey, dkey = jax.random.split(key)
    params = init_params(pkey, vocab_size, embed_dim, hidden_dim, num_classes,
                         n_filters, filter_sizes)
    prep = prepare_params(params, filter_sizes, num_classes)
    text_batch = jax.random.randint(dkey, (B, L), 0, vocab_size,
                                    dtype=jnp.int32)

    out = forward(prep, text_batch)
    out = jax.block_until_ready(out)
    assert out.shape == (B, num_classes) and out.dtype == jnp.float32

    ref = reference_forward(params, text_batch, filter_sizes)
    max_diff = float(jnp.max(jnp.abs(out - ref)))
    assert jnp.allclose(out, ref, atol=2e-2, rtol=2e-2), f"max|diff|={max_diff}"
    print("KERNEL_OK")
</pallas_src>

<mosaic_0001>
module attributes {stable_mosaic.version = 11 : i64} {
  func.func @fused_cnn_lstm_kernel(%arg0: i32, %arg1: memref<16x5xi32, #tpu.memory_space<vmem>>, %arg2: memref<5x50x48xbf16, #tpu.memory_space<vmem>>, %arg3: memref<1x48xf32, #tpu.memory_space<vmem>>, %arg4: memref<16x48xf32, #tpu.memory_space<vmem>>, %arg5: memref<48x192xbf16, #tpu.memory_space<vmem>>, %arg6: memref<1x192xf32, #tpu.memory_space<vmem>>, %arg7: memref<64x128xbf16, #tpu.memory_space<vmem>>, %arg8: memref<1x128xf32, #tpu.memory_space<vmem>>, %arg9: memref<1x1x128xf32, #tpu.memory_space<vmem>>) attributes {dimension_semantics = [#tpu.dimension_semantics<parallel>], iteration_bounds = array<i64: 2>, scalar_prefetch = 0 : i64, scratch_operands = 0 : i64, tpu.core_type = #tpu.core_type<tc>, window_params = [{transform_indices = @transform_0, window_bounds = array<i64: 16, 5>}, {pipeline_mode = #tpu.pipeline_mode<synchronous>, transform_indices = @transform_1, window_bounds = array<i64: 5, 50, 48>}, {pipeline_mode = #tpu.pipeline_mode<synchronous>, transform_indices = @transform_2, window_bounds = array<i64: 1, 48>}, {pipeline_mode = #tpu.pipeline_mode<synchronous>, transform_indices = @transform_3, window_bounds = array<i64: 16, 48>}, {pipeline_mode = #tpu.pipeline_mode<synchronous>, transform_indices = @transform_4, window_bounds = array<i64: 48, 192>}, {pipeline_mode = #tpu.pipeline_mode<synchronous>, transform_indices = @transform_5, window_bounds = array<i64: 1, 192>}, {pipeline_mode = #tpu.pipeline_mode<synchronous>, transform_indices = @transform_6, window_bounds = array<i64: 64, 128>}, {pipeline_mode = #tpu.pipeline_mode<synchronous>, transform_indices = @transform_7, window_bounds = array<i64: 1, 128>}, {transform_indices = @transform_8, window_bounds = array<i64: 1, 1, 128>}]} {
    %0 = tpu.iota {dimensions = array<i32: 1>} : vector<16x50xi32>
    %cst = arith.constant 0.000000e+00 : f32
    %1 = vector.broadcast %cst : f32 to vector<16x48xf32>
    %c0 = arith.constant 0 : index
    %c0_0 = arith.constant 0 : index
    %2 = vector.load %arg1[%c0, %c0_0] : memref<16x5xi32, #tpu.memory_space<vmem>>, vector<16x1xi32>
    %3 = vector.broadcast %2 : vector<16x1xi32> to vector<16x50xi32>
    %4 = arith.cmpi eq, %0, %3 : vector<16x50xi32>
    %5 = arith.extui %4 : vector<16x50xi1> to vector<16x50xi32>
    %6 = arith.sitofp %5 : vector<16x50xi32> to vector<16x50xf32>
    %7 = arith.truncf %6 : vector<16x50xf32> to vector<16x50xbf16>
    %c0_1 = arith.constant 0 : index
    %c0_2 = arith.constant 0 : index
    %c0_3 = arith.constant 0 : index
    %8 = vector.load %arg2[%c0_1, %c0_2, %c0_3] : memref<5x50x48xbf16, #tpu.memory_space<vmem>>, vector<1x50x48xbf16>
    %9 = vector.shape_cast %8 : vector<1x50x48xbf16> to vector<50x48xbf16>
    %cst_4 = arith.constant dense<0.000000e+00> : vector<16x48xf32>
    %10 = tpu.matmul %7, %9, %cst_4 {dimension_numbers = #tpu.dot_dimension_numbers<[1], [0], [0], [1], [0, 0, 1, 1], [], []>} : vector<16x50xbf16>, vector<50x48xbf16>, vector<16x48xf32> -> vector<16x48xf32>
    %11 = arith.addf %1, %10 : vector<16x48xf32>
    %c0_5 = arith.constant 0 : index
    %c1 = arith.constant 1 : index
    %12 = vector.load %arg1[%c0_5, %c1] : memref<16x5xi32, #tpu.memory_space<vmem>>, vector<16x1xi32>
    %13 = vector.broadcast %12 : vector<16x1xi32> to vector<16x50xi32>
    %14 = arith.cmpi eq, %0, %13 : vector<16x50xi32>
    %15 = arith.extui %14 : vector<16x50xi1> to vector<16x50xi32>
    %16 = arith.sitofp %15 : vector<16x50xi32> to vector<16x50xf32>
    %17 = arith.truncf %16 : vector<16x50xf32> to vector<16x50xbf16>
    %c1_6 = arith.constant 1 : index
    %c0_7 = arith.constant 0 : index
    %c0_8 = arith.constant 0 : index
    %18 = vector.load %arg2[%c1_6, %c0_7, %c0_8] : memref<5x50x48xbf16, #tpu.memory_space<vmem>>, vector<1x50x48xbf16>
    %19 = vector.shape_cast %18 : vector<1x50x48xbf16> to vector<50x48xbf16>
    %cst_9 = arith.constant dense<0.000000e+00> : vector<16x48xf32>
    %20 = tpu.matmul %17, %19, %cst_9 {dimension_numbers = #tpu.dot_dimension_numbers<[1], [0], [0], [1], [0, 0, 1, 1], [], []>} : vector<16x50xbf16>, vector<50x48xbf16>, vector<16x48xf32> -> vector<16x48xf32>
    %21 = arith.addf %11, %20 : vector<16x48xf32>
    %c0_10 = arith.constant 0 : index
    %c2 = arith.constant 2 : index
    %22 = vector.load %arg1[%c0_10, %c2] : memref<16x5xi32, #tpu.memory_space<vmem>>, vector<16x1xi32>
    %23 = vector.broadcast %22 : vector<16x1xi32> to vector<16x50xi32>
    %24 = arith.cmpi eq, %0, %23 : vector<16x50xi32>
    %25 = arith.extui %24 : vector<16x50xi1> to vector<16x50xi32>
    %26 = arith.sitofp %25 : vector<16x50xi32> to vector<16x50xf32>
    %27 = arith.truncf %26 : vector<16x50xf32> to vector<16x50xbf16>
    %c2_11 = arith.constant 2 : index
    %c0_12 = arith.constant 0 : index
    %c0_13 = arith.constant 0 : index
    %28 = vector.load %arg2[%c2_11, %c0_12, %c0_13] : memref<5x50x48xbf16, #tpu.memory_space<vmem>>, vector<1x50x48xbf16>
    %29 = vector.shape_cast %28 : vector<1x50x48xbf16> to vector<50x48xbf16>
    %cst_14 = arith.constant dense<0.000000e+00> : vector<16x48xf32>
    %30 = tpu.matmul %27, %29, %cst_14 {dimension_numbers = #tpu.dot_dimension_numbers<[1], [0], [0], [1], [0, 0, 1, 1], [], []>} : vector<16x50xbf16>, vector<50x48xbf16>, vector<16x48xf32> -> vector<16x48xf32>
    %31 = arith.addf %21, %30 : vector<16x48xf32>
    %c0_15 = arith.constant 0 : index
    %c3 = arith.constant 3 : index
    %32 = vector.load %arg1[%c0_15, %c3] : memref<16x5xi32, #tpu.memory_space<vmem>>, vector<16x1xi32>
    %33 = vector.broadcast %32 : vector<16x1xi32> to vector<16x50xi32>
    %34 = arith.cmpi eq, %0, %33 : vector<16x50xi32>
    %35 = arith.extui %34 : vector<16x50xi1> to vector<16x50xi32>
    %36 = arith.sitofp %35 : vector<16x50xi32> to vector<16x50xf32>
    %37 = arith.truncf %36 : vector<16x50xf32> to vector<16x50xbf16>
    %c3_16 = arith.constant 3 : index
    %c0_17 = arith.constant 0 : index
    %c0_18 = arith.constant 0 : index
    %38 = vector.load %arg2[%c3_16, %c0_17, %c0_18] : memref<5x50x48xbf16, #tpu.memory_space<vmem>>, vector<1x50x48xbf16>
    %39 = vector.shape_cast %38 : vector<1x50x48xbf16> to vector<50x48xbf16>
    %cst_19 = arith.constant dense<0.000000e+00> : vector<16x48xf32>
    %40 = tpu.matmul %37, %39, %cst_19 {dimension_numbers = #tpu.dot_dimension_numbers<[1], [0], [0], [1], [0, 0, 1, 1], [], []>} : vector<16x50xbf16>, vector<50x48xbf16>, vector<16x48xf32> -> vector<16x48xf32>
    %41 = arith.addf %31, %40 : vector<16x48xf32>
    %c0_20 = arith.constant 0 : index
    %c4 = arith.constant 4 : index
    %42 = vector.load %arg1[%c0_20, %c4] : memref<16x5xi32, #tpu.memory_space<vmem>>, vector<16x1xi32>
    %43 = vector.broadcast %42 : vector<16x1xi32> to vector<16x50xi32>
    %44 = arith.cmpi eq, %0, %43 : vector<16x50xi32>
    %45 = arith.extui %44 : vector<16x50xi1> to vector<16x50xi32>
    %46 = arith.sitofp %45 : vector<16x50xi32> to vector<16x50xf32>
    %47 = arith.truncf %46 : vector<16x50xf32> to vector<16x50xbf16>
    %c4_21 = arith.constant 4 : index
    %c0_22 = arith.constant 0 : index
    %c0_23 = arith.constant 0 : index
    %48 = vector.load %arg2[%c4_21, %c0_22, %c0_23] : memref<5x50x48xbf16, #tpu.memory_space<vmem>>, vector<1x50x48xbf16>
    %49 = vector.shape_cast %48 : vector<1x50x48xbf16> to vector<50x48xbf16>
    %cst_24 = arith.constant dense<0.000000e+00> : vector<16x48xf32>
    %50 = tpu.matmul %47, %49, %cst_24 {dimension_numbers = #tpu.dot_dimension_numbers<[1], [0], [0], [1], [0, 0, 1, 1], [], []>} : vector<16x50xbf16>, vector<50x48xbf16>, vector<16x48xf32> -> vector<16x48xf32>
    %51 = arith.addf %41, %50 : vector<16x48xf32>
    %52 = vector.shape_cast %51 : vector<16x48xf32> to vector<1x16x48xf32>
    %c0_25 = arith.constant 0 : index
    %c0_26 = arith.constant 0 : index
    %53 = vector.load %arg4[%c0_25, %c0_26] : memref<16x48xf32, #tpu.memory_space<vmem>>, vector<16x48xf32>
    %54 = vector.shape_cast %53 : vector<16x48xf32> to vector<1x16x48xf32>
    %55 = arith.addf %52, %54 : vector<1x16x48xf32>
    %cst_27 = arith.constant dense<0xFF800000> : vector<1x48xf32>
    %56 = vector.multi_reduction <maximumf>, %55, %cst_27 [1] : vector<1x16x48xf32> to vector<1x48xf32>
    %c0_28 = arith.constant 0 : index
    %c0_29 = arith.constant 0 : index
    %57 = vector.load %arg3[%c0_28, %c0_29] : memref<1x48xf32, #tpu.memory_space<vmem>>, vector<1x48xf32>
    %58 = arith.addf %56, %57 : vector<1x48xf32>
    %cst_30 = arith.constant 0.000000e+00 : f32
    %59 = vector.broadcast %cst_30 : f32 to vector<1x48xf32>
    %60 = arith.maximumf %58, %59 : vector<1x48xf32>
    %61 = arith.truncf %60 : vector<1x48xf32> to vector<1x48xbf16>
    %c0_31 = arith.constant 0 : index
    %c0_32 = arith.constant 0 : index
    %62 = vector.load %arg5[%c0_31, %c0_32] : memref<48x192xbf16, #tpu.memory_space<vmem>>, vector<48x192xbf16>
    %cst_33 = arith.constant dense<0.000000e+00> : vector<1x192xf32>
    %63 = tpu.matmul %61, %62, %cst_33 {dimension_numbers = #tpu.dot_dimension_numbers<[1], [0], [0], [1], [0, 0, 1, 1], [], []>} : vector<1x48xbf16>, vector<48x192xbf16>, vector<1x192xf32> -> vector<1x192xf32>
    %c0_34 = arith.constant 0 : index
    %c0_35 = arith.constant 0 : index
    %64 = vector.load %arg6[%c0_34, %c0_35] : memref<1x192xf32, #tpu.memory_space<vmem>>, vector<1x192xf32>
    %65 = arith.addf %63, %64 : vector<1x192xf32>
    %66 = vector.extract_strided_slice %65 {offsets = [0, 0], sizes = [1, 128], strides = [1, 1]} : vector<1x192xf32> to vector<1x128xf32>
    %67 = arith.negf %66 : vector<1x128xf32>
    %68 = math.exp %67 : vector<1x128xf32>
    %cst_36 = arith.constant 1.000000e+00 : f32
    %69 = vector.broadcast %cst_36 : f32 to vector<1x128xf32>
    %70 = arith.addf %69, %68 : vector<1x128xf32>
    %71 = arith.divf %69, %70 : vector<1x128xf32>
    %72 = vector.extract_strided_slice %65 {offsets = [0, 128], sizes = [1, 64], strides = [1, 1]} : vector<1x192xf32> to vector<1x64xf32>
    %73 = math.tanh %72 : vector<1x64xf32>
    %74 = vector.extract_strided_slice %71 {offsets = [0, 64], sizes = [1, 64], strides = [1, 1]} : vector<1x128xf32> to vector<1x64xf32>
    %75 = vector.extract_strided_slice %71 {offsets = [0, 0], sizes = [1, 64], strides = [1, 1]} : vector<1x128xf32> to vector<1x64xf32>
    %76 = arith.mulf %75, %73 : vector<1x64xf32>
    %77 = math.tanh %76 : vector<1x64xf32>
    %78 = arith.mulf %74, %77 : vector<1x64xf32>
    %79 = arith.truncf %78 : vector<1x64xf32> to vector<1x64xbf16>
    %c0_37 = arith.constant 0 : index
    %c0_38 = arith.constant 0 : index
    %80 = vector.load %arg7[%c0_37, %c0_38] : memref<64x128xbf16, #tpu.memory_space<vmem>>, vector<64x128xbf16>
    %cst_39 = arith.constant dense<0.000000e+00> : vector<1x128xf32>
    %81 = tpu.matmul %79, %80, %cst_39 {dimension_numbers = #tpu.dot_dimension_numbers<[1], [0], [0], [1], [0, 0, 1, 1], [], []>} : vector<1x64xbf16>, vector<64x128xbf16>, vector<1x128xf32> -> vector<1x128xf32>
    %c0_40 = arith.constant 0 : index
    %c0_41 = arith.constant 0 : index
    %82 = vector.load %arg8[%c0_40, %c0_41] : memref<1x128xf32, #tpu.memory_space<vmem>>, vector<1x128xf32>
    %83 = arith.addf %81, %82 : vector<1x128xf32>
    %c0_42 = arith.constant 0 : index
    %c0_43 = arith.constant 0 : index
    %c0_44 = arith.constant 0 : index
    %84 = vector.load %arg9[%c0_42, %c0_43, %c0_44] : memref<1x1x128xf32, #tpu.memory_space<vmem>>, vector<1x1x128xf32>
    %85 = vector.shape_cast %84 : vector<1x1x128xf32> to vector<1x128xf32>
    %86 = vector.shape_cast %83 : vector<1x128xf32> to vector<1x1x128xf32>
    tpu.vector_store %arg9[%c0_42, %c0_43, %c0_44], %86 {strides = array<i32>} : memref<1x1x128xf32, #tpu.memory_space<vmem>>, vector<1x1x128xf32>,
    return
  }
  func.func @transform_0(%arg0: i32) -> (i32, i32) {
    %c0_i32 = arith.constant 0 : i32
    %c0_i32_0 = arith.constant 0 : i32
    return %arg0, %c0_i32 : i32, i32
  }
  func.func @transform_1(%arg0: i32) -> (i32, i32, i32) {
    %c0_i32 = arith.constant 0 : i32
    %c0_i32_0 = arith.constant 0 : i32
    %c0_i32_1 = arith.constant 0 : i32
    %c0_i32_2 = arith.constant 0 : i32
    return %c0_i32, %c0_i32_0, %c0_i32_1 : i32, i32, i32
  }
  func.func @transform_2(%arg0: i32) -> (i32, i32) {
    %c0_i32 = arith.constant 0 : i32
    %c0_i32_0 = arith.constant 0 : i32
    %c0_i32_1 = arith.constant 0 : i32
    return %c0_i32, %c0_i32_0 : i32, i32
  }
  func.func @transform_3(%arg0: i32) -> (i32, i32) {
    %c0_i32 = arith.constant 0 : i32
    %c0_i32_0 = arith.constant 0 : i32
    %c0_i32_1 = arith.constant 0 : i32
    return %c0_i32, %c0_i32_0 : i32, i32
  }
  func.func @transform_4(%arg0: i32) -> (i32, i32) {
    %c0_i32 = arith.constant 0 : i32
    %c0_i32_0 = arith.constant 0 : i32
    %c0_i32_1 = arith.constant 0 : i32
    return %c0_i32, %c0_i32_0 : i32, i32
  }
  func.func @transform_5(%arg0: i32) -> (i32, i32) {
    %c0_i32 = arith.constant 0 : i32
    %c0_i32_0 = arith.constant 0 : i32
    %c0_i32_1 = arith.constant 0 : i32
    return %c0_i32, %c0_i32_0 : i32, i32
  }
  func.func @transform_6(%arg0: i32) -> (i32, i32) {
    %c0_i32 = arith.constant 0 : i32
    %c0_i32_0 = arith.constant 0 : i32
    %c0_i32_1 = arith.constant 0 : i32
    return %c0_i32, %c0_i32_0 : i32, i32
  }
  func.func @transform_7(%arg0: i32) -> (i32, i32) {
    %c0_i32 = arith.constant 0 : i32
    %c0_i32_0 = arith.constant 0 : i32
    %c0_i32_1 = arith.constant 0 : i32
    return %c0_i32, %c0_i32_0 : i32, i32
  }
  func.func @transform_8(%arg0: i32) -> (i32, i32, i32) {
    %c0_i32 = arith.constant 0 : i32
    %c0_i32_0 = arith.constant 0 : i32
    %c0_i32_1 = arith.constant 0 : i32
    return %arg0, %c0_i32, %c0_i32_0 : i32, i32, i32
  }
}

</mosaic_0001>

<bundles_post_ra>
// kernel: tpu_custom_call.1
= control target key start
LH: loop header
LB: loop body
LE: loop exit
PB: predicated region body
PF: predicated region fallthrough
CT: control target
= control target key end

     0   :  { %13 = vsyncpa [#allocation3], 0  ;;  %s1713_s0 = inlined_call_operand.vmem [shape: s32[32,5], index: 0, kind: input, shape index: {}]   ;;  %s1714_s1 = inlined_call_operand.vmem [shape: bf16[5,50,48], index: 1, kind: input, shape index: {}]   ;;  %s1715_s2 = inlined_call_operand.vmem [shape: f32[1,48], index: 2, kind: input, shape index: {}]   ;;  %s1716_s3 = inlined_call_operand.vmem [shape: f32[16,48], index: 3, kind: input, shape index: {}]   ;;  %s1717_s4 = inlined_call_operand.vmem [shape: bf16[48,192], index: 4, kind: input, shape index: {}]   ;;  %s1718_s5 = inlined_call_operand.vmem [shape: f32[1,192], index: 5, kind: input, shape index: {}]   ;;  %s1719_s6 = inlined_call_operand.vmem [shape: bf16[64,128], index: 6, kind: input, shape index: {}]   ;;  %s1720_s7 = inlined_call_operand.vmem [shape: f32[1,128], index: 7, kind: input, shape index: {}]   ;;  %s1721_s8 = inlined_call_operand.hbm [shape: f32[2,1,128], index: 8, kind: output, shape index: {}]  }
   0x1   :  { %15 = vsyncpa [#allocation3 + $0x1], 0  ;;  %s1437_s27 = smov 0   ;;  %s1439_s28 = smov 0  }
   0x2   :  { %s1441_s29 = smov 0   ;;  %s1443_s30 = smov 0  }
   0x3 LB: > { %s1458_s9 = sadd.s32 4294967295, %s1381_s30   ;;  %s1036_s10 = sadd.s32 4294967294, %s1381_s30   ;;  %s1381_s30 = sphi %s1443_s30, %s1727_s30   ;;  %s1377_s29 = sphi %s1441_s29, %s1726_s29   ;;  %s1373_s28 = sphi %s1439_s28, %s1725_s28   ;;  %s1369_s27 = sphi %s1437_s27, %s1724_s27  }
   0x4   : > { %s1462_s11 = sadd.s32 1, %s1381_s30   ;;  %s201_s12 = sadd.s32 1, %s1377_s29 }
   0x5   : > { %s198_s13 = ssub.s32 %s1381_s30, %s1462_s11  ;;  %p211_p0 = scmp.ne.s32.totalorder %s1377_s29, %s1373_s28 }
   0x6   : > { %p199_p1 = scmp.eq.s32.totalorder %s198_s13, 0  ;;  %p212_p2 = scmp.eq.s32.totalorder %s1458_s9, 1 }
   0x7   : > { %p217_p3 = scmp.ne.s32.totalorder %s1373_s28, %s1369_s27  ;;  %p218_p4 = scmp.eq.s32.totalorder %s1036_s10, 1 }
   0x8   : > { %s1473_s14 = scalar_select %p199_p1, %s1377_s29, %s201_s12  }
   0x9   : > { %p1475_p5 = por %p212_p2, %p211_p0  ;;  %p1479_p6 = por %p218_p4, %p217_p3 }
   0xa   : > { %p1039_p7 = scmp.ge.s32.totalorder %s1381_s30, 1  ;;  %p266_p8 = scmp.lt.s32.totalorder %s1381_s30, 3 }
   0xc   : > { %p267_p9 = pnand %p1039_p7, %p266_p8 }
   0xd   : > { %s1040_s17 = sshll.u32 (!%p267_p9), %s1458_s9, 1  ;;  %v1278_v0 = vld [vmem:[%s1714_s1 + $0x1c] sm:$0xff] (!%p267_p9)   ;;  %v1383_v1 = vmov (!%p267_p9), 1   ;;  %v1384_v2 = vmov (!%p267_p9), 0   ;;  %v1385_v4 = vmov (!%p267_p9), 0.0   ;;  %v1280_v5 = vld [vmem:[%s1714_s1 + $0x24] sm:$0xff] (!%p267_p9)   ;;  %v306_v18 = vlaneseq (!%p267_p9) }
   0xe   : > { %270 = sbr.rel (%p267_p9) target bundleno = 1147 (0x47b), region = 52  ;;  %1270 = vset.pattern.permute.xlu0 (!%p267_p9), %v1383_v1  ;;  %1271 = vset.pattern.permute.xlu1 (!%p267_p9), %v1384_v2  ;;  %p300_p10 = scmp.lt.s32.totalorder (!%p267_p9), %s1040_s17, 3  ;;  %v1279_v3 = vld [vmem:[%s1714_s1] sm:$0xff] (!%p267_p9)   ;;  %v1281_v6 = vld [vmem:[%s1714_s1 + $0x8] sm:$0xff] (!%p267_p9)   ;;  %v1283_v10 = vld [vmem:[%s1714_s1 + $0x10] sm:$0xff] (!%p267_p9)   ;;  %vm376_vm0 = vcmask (!%p267_p9), 1040384  }
   0xf   : > { %1151 = vmatprep.subr.bf16.mxu0 (!%p267_p9), %v1385_v4  ;;  %1163 = vmatprep.subr.bf16.mxu1 (!%p267_p9), %v1385_v4  ;;  %v1282_v7 = vld [vmem:[%s1714_s1 + $0x2c] sm:$0xff] (!%p267_p9)   ;;  %v1284_v11 = vld [vmem:[%s1714_s1 + $0x34] ss:$0 sps:$4 sm:$0x11] (!%p267_p9)   ;;  %v1386_v15 = vmov (!%p267_p9), 2   ;;  %vm1387_vm1 = vmmov (!%p267_p9), 0  }
  0x10   : > { %1152 = vmatpush3.bf16.msra.mxu0 (!%p267_p9), %v1278_v0  ;;  %1164 = vmatpush3.bf16.msra.mxu1 (!%p267_p9), %v1279_v3  ;;  %v1285_v12 = vld [vmem:[%s1714_s1 + $0x18] ss:$0 sps:$4 sm:$0x11] (!%p267_p9)   ;;  %v378_v13 = vsel (!%p267_p9), %vm376_vm0, %v1284_v11, 0  ;;  %v1388_v16 = vmov (!%p267_p9), 3   ;;  %v1389_v17 = vmov (!%p267_p9), 4  }
  0x11   : > { %1153 = vmatprep.subr.bf16.mxu0 (!%p267_p9), %v1385_v4  ;;  %1165 = vmatprep.subr.bf16.mxu1 (!%p267_p9), %v1385_v4  ;;  %v446_v14 = vsel (!%p267_p9), %vm376_vm0, %v1285_v12, 0  ;;  %v1531_v19 = vand.u32 (!%p267_p9), 127, %v306_v18  ;;  %vm372_vm6 = vcmask (!%p267_p9), 408576   ;;  %v1286_v28 = vld [vmem:[%s1714_s1 + $0x38] sm:$0xff] (!%p267_p9)   ;;  %v1288_v34 = vld [vmem:[%s1714_s1 + $0x40] sm:$0xff] (!%p267_p9)   ;;  %v1290_v36 = vld [vmem:[%s1714_s1 + $0x48] sm:$0xff] (!%p267_p9)  }
  0x12   : > { %1159 = vmatprep.mubr.msk.bf16.mxu0 (!%p267_p9), %vm1387_vm1, %v1385_v4  ;;  %1171 = vmatprep.mubr.msk.bf16.mxu1 (!%p267_p9), %vm1387_vm1, %v1385_v4  ;;  %v1287_v29 = vld [vmem:[%s1714_s1 + $0x54] sm:$0xff] (!%p267_p9)   ;;  %v1289_v35 = vld [vmem:[%s1714_s1 + $0x5c] sm:$0xff] (!%p267_p9)   ;;  %v1291_v37 = vld [vmem:[%s1714_s1 + $0x64] sm:$0xff] (!%p267_p9)   ;;  %vm766_vm13 = vcmask (!%p267_p9), 392192   ;;  %s1390_s23 = smov (!%p267_p9), 64   ;;  %vm923_vm14 = vcmask (!%p267_p9), 523264  }
  0x13   : > { %v1292_v40 = vld [vmem:[%s1714_s1 + $0x50] ss:$0 sps:$4 sm:$0x11] (!%p267_p9)   ;;  %v1293_v41 = vld [vmem:[%s1714_s1 + $0x6c] ss:$0 sps:$4 sm:$0x11] (!%p267_p9)  }
  0x14   : > { %1154 = vmatpush3.bf16.msra.mxu0 (!%p267_p9), %v1280_v5  ;;  %1166 = vmatpush3.bf16.msra.mxu1 (!%p267_p9), %v1281_v6  ;;  %v535_v46 = vsel (!%p267_p9), %vm376_vm0, %v1292_v40, 0  ;;  %v626_v47 = vsel (!%p267_p9), %vm376_vm0, %v1293_v41, 0  ;;  %v1294_v50 = vld [vmem:[%s1714_s1 + $0x70] sm:$0xff] (!%p267_p9)   ;;  %v1295_v52 = vld [vmem:[%s1714_s1 + $0x78] sm:$0xff] (!%p267_p9)   ;;  %v1296_v54 = vld [vmem:[%s1714_s1 + $0x80] sm:$0xff] (!%p267_p9)  }
  0x15   : > { %s1729_s17 = smov (!%p300_p10, %s1040_s17), 3  ;;  %1155 = vmatprep.subr.bf16.mxu0 %v1385_v4  ;;  %1167 = vmatprep.subr.bf16.mxu1 %v1385_v4  ;;  %v1297_v55 = vld [vmem:[%s1714_s1 + $0x88] ss:$0 sps:$4 sm:$0x11]   ;;  %v1300_v60 = vld [vmem:[%s1717_s4 + $0x4] ss:$8 sps:$4 sm:$0xff]  }
  0x16   : > { %s1041_s26 = sshll.u32 %s1729_s17, 3  ;;  %v717_v56 = vsel %vm376_vm0, %v1297_v55, 0  ;;  %v1298_v61 = vld [vmem:[%s1717_s4] ss:$8 sps:$4 sm:$0xff]   ;;  %v1303_v62 = vld [vmem:[%s1717_s4 + $0x14] ss:$8 sps:$4 sm:$0xff]  }
  0x17   : > { %s303_s13 = scalar_lea.vmem %s1713_s0, %s1041_s26  ;;  %v1301_v63 = vld [vmem:[%s1717_s4 + $0x10] ss:$8 sps:$4 sm:$0xff]   ;;  %v1306_v0 = vld [vmem:[%s1717_s4 + $0x24] ss:$8 sps:$4 sm:$0xff]   ;;  %v1304_v1 = vld [vmem:[%s1717_s4 + $0x20] ss:$8 sps:$4 sm:$0xff]  }
  0x18   : > { %v308_v8 = vld [vmem:[%s303_s13] sm:$0xff]  ;;  %v309_v9 = vld [vmem:[%s303_s13 + $0x8] sm:$0xff]  ;;  %1156 = vmatpush3.bf16.msra.mxu0 %v1282_v7  ;;  %1168 = vmatpush3.bf16.msra.mxu1 %v1283_v10  ;;  %s297_s26 = sand.u32 1, %s1373_s28   ;;  %s1118_s13 = sshll.u32 %s1458_s9, 4 }
  0x19   : > { %311 = vperm.xlu1 %1271, %v308_v8   ;;  %331 = vperm.xlu0 %1270, %v308_v8   ;;  %s298_s18 = scalar_lea.vmem [#allocation2], %s297_s26  ;;  %s1671_s17 = scalar_lea.hbm %s1721_s8, %s1118_s13 }
  0x1a   : > { %1157 = vmatprep.subr.bf16.mxu0 %v1385_v4  ;;  %1169 = vmatprep.subr.bf16.mxu1 %v1385_v4  ;;  %s981_s19 = sshll.u32 %s298_s18, 4  ;;  %s969_s22 = scalar_lea.sflag [#allocation3], %s297_s26  ;;  %s1673_s19 = int_to_ptr.vmem [resolvable:$true] %s981_s19 }
  0x1b   : > { %s1319_s9 = scalar_lea.vmem %s1673_s19, 16 }
  0x1c   : > { %1158 = vmatpush3.bf16.msra.mxu0 %v378_v13  ;;  %1170 = vmatpush3.bf16.msra.mxu1 %v446_v14  ;;  %p1320_p11 = scmp.ne.s32.totalorder %s1673_s19, %s1319_s9 }
  0x1d   : > { %314 = vperm.xlu1 %1271, %v309_v9   ;;  %334 = vperm.xlu0 %1270, %v309_v9  }
  0x1e   : > { %1175 = vmatprep.subr.bf16.mxu0 %v1385_v4  ;;  %1187 = vmatprep.subr.bf16.mxu1 %v1385_v4  ;;  %p1321_p12 = pnand %p1320_p11, %p1475_p5 }
  0x20   : > { %p1322_p13 = pneg %p1321_p12 }
  0x21   : > { %1273 = vset.pattern.permute.xlu1 %v1386_v15  ;;  %1272 = vset.pattern.permute.xlu0 %v1386_v15 }
  0x22   : > { %493 = vperm.xlu1 %1273, %v309_v9   ;;  %490 = vperm.xlu0 %1272, %v308_v8  }
  0x26   : > { %1274 = vset.pattern.permute.xlu1 %v1388_v16  ;;  %1275 = vset.pattern.permute.xlu0 %v1388_v16 }
  0x27   : > { %581 = vperm.xlu1 %1274, %v308_v8   ;;  %584 = vperm.xlu0 %1275, %v309_v9  }
  0x2b   : > { %1276 = vset.pattern.permute.xlu1 %v1389_v17  ;;  %1277 = vset.pattern.permute.xlu0 %v1389_v17 }
  0x2c   : > { %672 = vperm.xlu1 %1276, %v308_v8  }
  0x30   : > { %675 = vperm.xlu1 %1276, %v309_v9  }
  0x98   : > { %v312_v20 = vpop.permute.xlu1 %311  ;;  %v332_v21 = vpop.permute.xlu0 %331 }
  0x99   : > { %vm316_vm2 = vcmp.eq.s32.totalorder %v1531_v19, %v312_v20  ;;  %vm336_vm3 = vcmp.eq.s32.totalorder %v1531_v19, %v332_v21 }
  0x9a   : > { %v1042_v22 = vsel %vm316_vm2, 1.0, %v1385_v4  ;;  %v1044_v25 = vsel %vm336_vm3, 1.0, %v1385_v4 }
  0x9c   : > { %v315_v23 = vpop.permute.xlu1 %314  ;;  %v335_v24 = vpop.permute.xlu0 %334 }
  0x9d   : > { %vm317_vm4 = vcmp.eq.s32.totalorder %v1531_v19, %v315_v23  ;;  %vm337_vm5 = vcmp.eq.s32.totalorder %v1531_v19, %v335_v24 }
  0x9e   : > { %v1043_v26 = vsel %vm317_vm4, 1.0, %v1385_v4  ;;  %v1045_v27 = vsel %vm337_vm5, 1.0, %v1385_v4 }
  0x9f   : > { %v322_v30 = vpack.c.bf16 %v1043_v26, %v1042_v22  ;;  %v342_v31 = vpack.c.bf16 %v1045_v27, %v1044_v25  ;;  %v762_v27 = vld [vmem:[%s1716_s3] sm:$0xff] }
  0xa1   : > { %1160 = vmatmul.mubr.msk.bf16.vlgmr.msra.gmra.mrb[0].mxu0 %vm372_vm6, %v342_v31  ;;  %1172 = vmatmul.mubr.msk.bf16.vlgmr.msra.gmra.mrb[0].mxu1 %vm372_vm6, %v322_v30  ;;  %v494_v32 = vpop.permute.xlu1 %493  ;;  %v491_v33 = vpop.permute.xlu0 %490  ;;  %v763_v31 = vld [vmem:[%s1716_s3 + $0x8] sm:$0xff] }
  0xa2   : > { %1176 = vmatpush3.bf16.msra.mxu0 %v1286_v28  ;;  %1188 = vmatpush3.bf16.msra.mxu1 %v1287_v29  ;;  %vm496_vm7 = vcmp.eq.s32.totalorder %v1531_v19, %v494_v32  ;;  %vm495_vm8 = vcmp.eq.s32.totalorder %v1531_v19, %v491_v33 }
  0xa3   : > { %1177 = vmatprep.subr.bf16.mxu0 %v1385_v4  ;;  %1189 = vmatprep.subr.bf16.mxu1 %v1385_v4  ;;  %v1064_v42 = vsel %vm496_vm7, 1.0, %v1385_v4  ;;  %v1063_v43 = vsel %vm495_vm8, 1.0, %v1385_v4 }
  0xa4   : > { %1183 = vmatprep.mubr.msk.bf16.mxu0 %vm1387_vm1, %v1385_v4  ;;  %1195 = vmatprep.mubr.msk.bf16.mxu1 %vm1387_vm1, %v1385_v4  ;;  %v501_v48 = vpack.c.bf16 %v1064_v42, %v1063_v43 }
  0xa6   : > { %1178 = vmatpush3.bf16.msra.mxu0 %v1288_v34  ;;  %1190 = vmatpush3.bf16.msra.mxu1 %v1289_v35  ;;  %v582_v38 = vpop.permute.xlu1 %581  ;;  %v585_v39 = vpop.permute.xlu0 %584 }
  0xa7   : > { %1179 = vmatprep.subr.bf16.mxu0 %v1385_v4  ;;  %1191 = vmatprep.subr.bf16.mxu1 %v1385_v4  ;;  %vm586_vm9 = vcmp.eq.s32.totalorder %v1531_v19, %v582_v38  ;;  %vm587_vm10 = vcmp.eq.s32.totalorder %v1531_v19, %v585_v39 }
  0xa8   : > { %v1077_v44 = vsel %vm586_vm9, 1.0, %v1385_v4  ;;  %v1078_v45 = vsel %vm587_vm10, 1.0, %v1385_v4 }
  0xa9   : > { %v592_v49 = vpack.c.bf16 %v1078_v45, %v1077_v44  ;;  %v776_v44 = vld [vmem:[%s1715_s2] sm:$0x1] }
  0xaa   : > { %1180 = vmatpush3.bf16.msra.mxu0 %v1290_v36  ;;  %1192 = vmatpush3.bf16.msra.mxu1 %v1291_v37 }
  0xab   : > { %1181 = vmatprep.subr.bf16.mxu0 %v1385_v4  ;;  %1193 = vmatprep.subr.bf16.mxu1 %v1385_v4  ;;  %v673_v51 = vpop.permute.xlu1 %672 }
  0xac   : > { %vm677_vm11 = vcmp.eq.s32.totalorder %v1531_v19, %v673_v51  ;;  %v786_v51 = vld [vmem:[%s1718_s5] sm:$0x3] }
  0xad   : > { %v1091_v57 = vsel %vm677_vm11, 1.0, %v1385_v4 }
  0xae   : > { %1182 = vmatpush3.bf16.msra.mxu0 %v535_v46  ;;  %1194 = vmatpush3.bf16.msra.mxu1 %v626_v47 }
  0xaf   : > { %1199 = vmatprep.subr.bf16.mxu0 %v1385_v4  ;;  %v676_v53 = vpop.permute.xlu1 %675  ;;  %831 = vmatprep.subr.bf16.mxu1 %v1300_v60 }
  0xb0   : > { %vm678_vm12 = vcmp.eq.s32.totalorder %v1531_v19, %v676_v53 }
  0xb1   : > { %1184 = vmatmul.mubr.msk.bf16.vlgmr.msra.gmra.mrb[4].mxu0 %vm372_vm6, %v501_v48  ;;  %1196 = vmatmul.mubr.msk.bf16.vlgmr.msra.gmra.mrb[4].mxu1 %vm372_vm6, %v592_v49  ;;  %v1092_v58 = vsel %vm678_vm12, 1.0, %v1385_v4  ;;  %v819_v49 = vshrl.u32 %v306_v18, 7 }
  0xb2   : > { %1200 = vmatpush3.bf16.msra.mxu0 %v1294_v50  ;;  %1207 = vmatprep.mubr.msk.bf16.mxu0 %vm1387_vm1, %v1385_v4  ;;  %v683_v59 = vpack.c.bf16 %v1092_v58, %v1091_v57 }
  0xb3   : > { %1201 = vmatprep.subr.bf16.mxu0 %v1385_v4  ;;  %863 = vmatprep.mubr.bf16.mxu1 %v1384_v2  ;;  %v820_v50 = vsub.s32 0, %v819_v49 }
  0xb4   : > { %832 = vmatpush1.bf16.msra.mxu1 %v1298_v61 }
  0xb5   : > { %833 = vmatprep.subr.bf16.mxu1 %v1303_v62 }
  0xb6   : > { %1202 = vmatpush3.bf16.msra.mxu0 %v1295_v52  ;;  %v821_v52 = vrot.slane %v786_v51, %v820_v50 }
  0xb7   : > { %1203 = vmatprep.subr.bf16.mxu0 %v1385_v4 }
  0xb8   : > { %834 = vmatpush1.bf16.msra.mxu1 %v1301_v63 }
  0xb9   : > { %835 = vmatprep.subr.bf16.mxu1 %v1306_v0 }
  0xba   : > { %1204 = vmatpush3.bf16.msra.mxu0 %v1296_v54 }
  0xbb   : > { %1205 = vmatprep.subr.bf16.mxu0 %v1385_v4 }
  0xbc   : > { %836 = vmatpush1.bf16.msra.mxu1 %v1304_v1 }
  0xbd   : > { %1211 = vmatprep.subr.bf16.mxu1 %v1385_v4 }
  0xbe   : > { %1206 = vmatpush3.bf16.msra.mxu0 %v717_v56 }
  0xc1   : > { %1208 = vmatmul.mubr.msk.bf16.vlgmr.msra.gmra.mrb[8].mxu0 %vm372_vm6, %v683_v59  ;;  %v824_v59 = vsub.s32 1, %v819_v49 }
  0xc3   : > { %v825_v60 = vrot.slane %v786_v51, %v824_v59 }
 0x174   : > { %v414_v2 = vpop.f32.mrb[0].mxu0  ;;  %v482_v3 = vpop.f32.mrb[0].mxu1 }
 0x175   : > { %v483_v5 = vadd.f32 %v482_v3, %v414_v2  ;;  %v1161_v6 = vpop.f32.mrb[1].mxu0  ;;  %v1173_v7 = vpop.f32.mrb[1].mxu1  ;;  %v1307_v2 = vld [vmem:[%s1719_s6] sm:$0xff]   ;;  %v1308_v3 = vld [vmem:[%s1719_s6 + $0x8] sm:$0xff]  }
 0x176   : > { %v417_v8 = vpop.f32.mrb[2].mxu0  ;;  %v485_v9 = vpop.f32.mrb[2].mxu1  ;;  %v1310_v7 = vld [vmem:[%s1719_s6 + $0x18] sm:$0xff]  }
 0x177   : > { %v486_v10 = vadd.f32 %v485_v9, %v417_v8  ;;  %v1162_v11 = vpop.f32.mrb[3].mxu0  ;;  %v1174_v12 = vpop.f32.mrb[3].mxu1 }
 0x178   : > { %v895_v12 = vld [vmem:[%s1720_s7] sm:$0x1] }
 0x184   : > { %v571_v13 = vpop.f32.mrb[4].mxu0  ;;  %v662_v14 = vpop.f32.mrb[4].mxu1 }
 0x185   : > { %v578_v15 = vadd.f32 %v571_v13, %v483_v5  ;;  %v1185_v16 = vpop.f32.mrb[5].mxu0  ;;  %v1197_v17 = vpop.f32.mrb[5].mxu1  ;;  %v1309_v5 = vld [vmem:[%s1719_s6 + $0x10] sm:$0xff]  }
 0x186   : > { %v574_v19 = vpop.f32.mrb[6].mxu0  ;;  %v665_v20 = vpop.f32.mrb[6].mxu1 }
 0x187   : > { %v579_v21 = vadd.f32 %v574_v19, %v486_v10  ;;  %v669_v22 = vadd.f32 %v662_v14, %v578_v15  ;;  %v1186_v23 = vpop.f32.mrb[7].mxu0  ;;  %v1198_v24 = vpop.f32.mrb[7].mxu1 }
 0x189   : > { %v670_v25 = vadd.f32 %v665_v20, %v579_v21 }
 0x194   : > { %v753_v26 = vpop.f32.mrb[8].mxu0 }
 0x195   : > { %v760_v28 = vadd.f32 %v753_v26, %v669_v22  ;;  %v1209_v29 = vpop.f32.mrb[9].mxu0 }
 0x196   : > { %v756_v30 = vpop.f32.mrb[10].mxu0 }
 0x197   : > { %v764_v32 = vadd.f32 %v762_v27, %v760_v28  ;;  %v761_v33 = vadd.f32 %v756_v30, %v670_v25  ;;  %v1210_v34 = vpop.f32.mrb[11].mxu0 }
 0x199   : > { %v765_v35 = vadd.f32 %v763_v31, %v761_v33  ;;  %v767_v36 = vsel %vm766_vm13, %v764_v32, -inf }
 0x19b   : > { %v768_v37 = vsel %vm766_vm13, %v765_v35, -inf }
 0x19c   : > { %v769_v38 = vmax.f32 %v767_v36, %v768_v37 }
 0x19e   : > { %v770_v39 = vrot.slane %v769_v38, 4 }
 0x1a0   : > { %v771_v40 = vmax.f32 %v769_v38, %v770_v39 }
 0x1a2   : > { %v772_v41 = vrot.slane %v771_v40, 2 }
 0x1a4   : > { %v773_v42 = vmax.f32 %v771_v40, %v772_v41 }
 0x1a6   : > { %v774_v43 = vrot.slane %v773_v42, 1 }
 0x1a8   : > { %v775_v45 = vmax.f32 %v773_v42, %v774_v43 }
 0x1aa   : > { %v777_v46 = vadd.f32 %v776_v44, %v775_v45 }
 0x1ac   : > { %v778_v47 = vmax.f32 %v777_v46, 0.0 }
 0x1ae   : > { %v779_v48 = vpack.c.bf16 %v778_v47, %v778_v47 }
 0x1b0   : > { %1111 = vmatmul.mubr.msk.bf16.vlgmr.msra.gmra.mrb[8].mxu1 %vm766_vm13, %v779_v48 }
 0x1b1   : > { %1219 = vmatprep.mubr.msk.bf16.mxu1 %vm1387_vm1, %v1385_v4  ;;  %1212 = vmatpush3.bf16.msra.mxu1 %v1307_v2 }
 0x1b2   : > { %1213 = vmatprep.subr.bf16.mxu1 %v1385_v4 }
 0x1b5   : > { %1214 = vmatpush3.bf16.msra.mxu1 %v1308_v3 }
 0x1b6   : > { %1215 = vmatprep.subr.bf16.mxu1 %v1385_v4 }
 0x1b9   : > { %1216 = vmatpush3.bf16.msra.mxu1 %v1309_v5 }
 0x1ba   : > { %1217 = vmatprep.subr.bf16.mxu1 %v1385_v4 }
 0x1bd   : > { %1218 = vmatpush3.bf16.msra.mxu1 %v1310_v7 }
 0x283   : > { %v865_v53 = vpop.f32.mrb[8].mxu1 }
 0x284   : > { %v866_v54 = vadd.f32 %v865_v53, %v821_v52  ;;  %v867_v55 = vpop.f32.mrb[9].mxu1 }
 0x285   : > { %v869_v56 = vpop.f32.mrb[10].mxu1  ;;  %v868_v61 = vadd.f32 %v867_v55, %v825_v60 }
 0x286   : > { %v1112_v57 = vmul.f32 -1.442695, %v866_v54  ;;  %v870_v58 = vpop.f32.mrb[11].mxu1 }
 0x288   : > { %1311 = vpow2.f32 %v1112_v57 }
 0x289   : > { %1313 = vtanh.f32 %v868_v61 }
 0x292   : > { %v1312_v62 = vpop.eup %1311 }
 0x293   : > { %v875_v63 = vadd.f32 1.0, %v1312_v62  ;;  %v1314_v18 = vpop.eup %1313 }
 0x295   : > { %1315 = vrcp.f32 %v875_v63 }
 0x29f   : > { %v1316_v0 = vpop.eup %1315 }
 0x2a0   : > { %v879_v1 = vmul.f32 %v1316_v0, %v1314_v18 }
 0x2a2   : > { %1317 = vtanh.f32 %v879_v1 }
 0x2ac   : > { %v1318_v6 = vpop.eup %1317 }
 0x2ad   : > { %882 = vrot.lane.b32.xlu0 %v1318_v6, %s1390_s23 }
 0x31f   : > { %v883_v8 = vpop.permute.xlu0 %882 }
 0x320   : > { %v885_v9 = vmul.f32 %v1316_v0, %v883_v8 }
 0x322   : > { %v886_v10 = vpack.c.bf16 %v885_v9, %v885_v9 }
 0x324   : > { %897 = vrot.lane.b32.xlu1 %v886_v10, %s1390_s23  ;;  %s1391_s23 = smov [#allocation2]  }
 0x325   : > { %s1323_s24 = sshll.u32 %s1391_s23, 4  ;;  %s1324_s24 = int_to_ptr.vmem [resolvable:$false] %s1323_s24 }
 0x326   : > { %s1325_s25 = scalar_lea.vmem %s1324_s24, 32  ;;  %p1326_p0 = scmp.lt.s32.totalorder %s1673_s19, %s1324_s24 }
 0x327   : > { %p1327_p1 = scmp.lt.s32.totalorder %s1325_s25, %s1319_s9 }
 0x329   : > { %p1328_p2 = por %p1327_p1, %p1326_p0 }
 0x32b   : > { %p1329_p3 = pnand %p1328_p2, %p1322_p13 }
 0x396   : > { %v898_v11 = vpop.permute.xlu1 %897 }
 0x397   : > { %1220 = vmatmul.mubr.msk.bf16.vlgmr.msra.gmra.mrb[12].mxu1 %vm923_vm14, %v898_v11 }
 0x46a   : > { %v961_v13 = vpop.f32.mrb[12].mxu1 }
 0x46b   : > { %v962_v14 = vadd.f32 %v961_v13, %v895_v12  ;;  %v1221_v4 = vpop.f32.mrb[13].mxu1 }
 0x46c   : > { %v964_v15 = vpop.f32.mrb[14].mxu1 }
 0x46d   : > { %967 = vst [vmem:[%s298_s18] sm:$0x1] %v962_v14  ;;  %v1222_v16 = vpop.f32.mrb[15].mxu1 }
 0x46e   : > { %1332 = shalt.err (!%p1329_p3)
}
 0x46f   : > { %s1333_s26 = scalar_lea.hbm %s1671_s17, 16  ;;  %s1337_s13 = scalar_lea.hbm %s1721_s8, 32 }
 0x470   : > { %p1334_p4 = scmp.ne.s32.totalorder %s1671_s17, %s1333_s26  ;;  %p1338_p9 = scmp.lt.u32.totalorder %s1671_s17, %s1721_s8 }
 0x471   : > { %p1339_p10 = scmp.lt.u32.totalorder %s1337_s13, %s1333_s26  ;;  %p1341_p12 = scmp.lt.u32.totalorder %s1333_s26, %s1671_s17 }
 0x472   : > { %p1335_p7 = pnand %p1334_p4, %p1475_p5 }
 0x473   : > { %p1340_p11 = por %p1339_p10, %p1338_p9 }
 0x474   : > { %p1336_p8 = pneg %p1335_p7 }
 0x475   : > { %p1342_p13 = por %p1341_p12, %p1340_p11 }
 0x477   : > { %p1343_p0 = pnand %p1342_p13, %p1336_p8 }
 0x479   : > { %1346 = shalt.err (!%p1343_p0)
}
 0x47a   : > { %1223 = dma.vmem_to_hbm [thread:$0]  (%p1475_p5), %s1673_s19, 16, %s1671_s17, %s969_s22  }
 0x47b PF: > { %p1229_p1 = scmp.ge.s32.totalorder %s1381_s30, 2  ;;  %s993_s21 = sand.u32 1, %s1369_s27  }
 0x47c   : > { %s994_s9 = scalar_lea.sflag [#allocation3], %s993_s21 }
 0x47d   : > { %p1226_p2 = pnand %p1229_p1, %p1479_p6 }
 0x47f   : > { %1364 = dma.done.wait (!%p1226_p2), %s994_s9, 16  }
 0x480   : > { %1366 = vsyncadd (!%p1226_p2), %s994_s9, 4294967280  ;;  %p18_p3 = scmp.ge.s32.totalorder %s1462_s11, 4   ;;  %s1724_s27 = smov %s1373_s28 }
 0x481   : > { %s1725_s28 = smov %s1377_s29  ;;  %s1726_s29 = smov %s1473_s14 }
 0x482   : > { %s1727_s30 = smov %s1462_s11  ;;  %20 = sbr.rel (!%p18_p3) target bundleno = 3 (0x3), region = 91 }
 0x489   :  { %998 = vsyncpa [#allocation3], 1 }
 0x48a   :  { %1000 = vsyncpa [#allocation3 + $0x1], 1 }

</bundles_post_ra>
